<compile_context>
chip_gen: v5e
topology: v5e:2x2
jax: 0.10.0
libtpu: 0.0.40
codegen_flags: <defaults>
</compile_context>

<pallas_src>
import functools

import jax
import jax.numpy as jnp
from jax.experimental import pallas as pl
from jax.experimental.pallas import tpu as pltpu


def _focal_loss_kernel(logits_ref, targets_ref, out_ref, *, gamma, alpha, n_rows, tile_n):
    """One row-tile: per-sample focal loss, masked partial sum -> one output block."""
    i = pl.program_id(0)

    # Cast AFTER the load so bf16 (or whatever the model emits) stays narrow on the HBM wire.
    x = logits_ref[...].astype(jnp.float32)                  # (T, C)
    tgt = targets_ref[...]                                    # (T, 1) int32
    t, c = x.shape

    # Mask rows past the true N (last tile may be ragged; its OOB tail is undefined data).
    row = jax.lax.broadcasted_iota(jnp.int32, (t, 1), 0)
    valid = (i * tile_n + row) < n_rows                       # (T, 1) bool

    # Gather the target-class logit via a lane-index compare (no dynamic gather on TPU).
    col = jax.lax.broadcasted_iota(jnp.int32, (t, c), 1)      # (T, C)
    tgt_logit = jnp.sum(jnp.where(col == tgt, x, 0.0), axis=-1, keepdims=True)

    # --- cross entropy per sample (reduction='none') ---
    m = jnp.max(x, axis=-1, keepdims=True)                                    # (T, 1)
    s = jnp.sum(jnp.exp(x - m), axis=-1, keepdims=True)                       # (T, 1)
    # Clamp: f32 rounding can make lse - tgt_logit slightly negative, which would give
    # pt > 1 and NaN through pow(negative, fractional_gamma).
    ce = jnp.maximum(m + jnp.log(s) - tgt_logit, 0.0)                         # (T, 1)

    # --- focal reweighting ---
    pt = jnp.exp(-ce)                        # cheap: (T, 1) EUP exp
    w = jnp.maximum(1.0 - pt, 0.0)           # focal base weight, in [0, 1]
    g = float(gamma)
    if g == 2.0:
        wg = w * w                           # VPU multiply instead of pow (exp+log on the EUP)
    elif g.is_integer():
        wg = w ** int(g)                     # lax.integer_pow -> repeated multiplies
    else:
        wg = jnp.power(w, g)                 # fractional gamma: safe since w >= 0
    focal = alpha * wg * ce                                                   # (T, 1)

    partial = jnp.sum(jnp.where(valid, focal, 0.0))           # scalar partial for this tile

    # Write the partial into lane 0 of this tile's (1, 1, 128) output block (one dense store).
    lane = jax.lax.broadcasted_iota(jnp.int32, (1, 1, 128), 2)
    out_ref[...] = jnp.where(lane == 0, partial, 0.0)


def _choose_tile_rows(n, c, itemsize):
    """Bytes-only row-tile chooser (no fixed row cap).

    Budgets the full per-tile VMEM footprint:
      * 2x double-buffered logits tiles (native dtype),
      * 2x double-buffered (T, 1) int32 targets tiles (lane-padded to 128),
      * ~6 live f32 (T, C) body temporaries (cast / iota / select / exp),
    against ~40 MiB (vmem_limit is 48 MiB), and caps the tile so the 1-D parallel grid has
    at least ~4 steps for v7x's two TensorCores.
    """
    itemsize = max(int(itemsize), 1)
    sub = max(8, 32 // itemsize)                  # 8 for f32, 16 for bf16, 32 for int8/fp8
    vmem_budget = 40 << 20

    per_row = 2 * c * itemsize + 2 * 128 * 4 + 6 * c * 4
    rows_budget = max(sub, (vmem_budget // per_row) // sub * sub)

    cdiv = lambda a, b: -(-a // b)
    rows_grid = cdiv(cdiv(n, 4), sub) * sub       # keep >= ~4 grid steps (megacore)
    rows_n = cdiv(n, sub) * sub                   # never bigger than (padded) N

    return int(max(sub, min(rows_budget, rows_grid, rows_n)))


def _focal_loss_pallas(logits, targets, gamma=2.0, alpha=1.0, tile_n=None):
    """Pallas TPU implementation of FocalLoss.forward (mean focal loss)."""
    n, c = logits.shape
    if tile_n is None:
        tile_n = _choose_tile_rows(n, c, jnp.dtype(logits.dtype).itemsize)
    tile_n = int(tile_n)
    num_tiles = int(pl.cdiv(n, tile_n))

    # (N,) -> (N, 1) is metadata-only.
    # TODO(synk): a lane-dense (num_tiles, tile_n) targets layout would shrink this buffer
    # ~128x and make its DMA contiguous, but needs a lane->sublane relayout in-kernel.
    targets2d = targets.reshape(n, 1).astype(jnp.int32)

    kernel = functools.partial(
        _focal_loss_kernel,
        gamma=float(gamma), alpha=float(alpha), n_rows=int(n), tile_n=tile_n,
    )

    partials = pl.pallas_call(
        kernel,
        out_shape=jax.ShapeDtypeStruct((num_tiles, 1, 128), jnp.float32),
        grid=(num_tiles,),
        in_specs=[
            pl.BlockSpec((tile_n, c), lambda i: (i, 0)),   # logits row-tile (native dtype)
            pl.BlockSpec((tile_n, 1), lambda i: (i, 0)),   # targets (lane-padded in VMEM)
        ],
        out_specs=pl.BlockSpec((1, 1, 128), lambda i: (i, 0, 0)),
        compiler_params=pltpu.CompilerParams(
            # Per-tile partials are independent -> 'parallel' lets v7x's 2 TensorCores each
            # stream a share of the HBM traffic (no-op on single-TC v5e/v6e).
            dimension_semantics=("parallel",),
            vmem_limit_bytes=48 * 1024 * 1024,
        ),
    )(logits, targets2d)

    # Second (tiny) reduction pass in XLA; divide by the true N, not the padded row count.
    return jnp.sum(partials) / jnp.float32(n)


def _focal_loss_xla(logits, targets, gamma=2.0, alpha=1.0):
    """Fused-XLA fallback / reference mirroring F.cross_entropy + focal term (scalar alpha)."""
    logp = jax.nn.log_softmax(logits.astype(jnp.float32), axis=-1)
    ce = -jnp.take_along_axis(logp, targets[:, None].astype(jnp.int32), axis=-1)[:, 0]
    pt = jnp.exp(-ce)
    return jnp.mean(alpha * (1.0 - pt) ** gamma * ce)


def focal_loss(logits, targets, gamma=2.0, alpha=1.0, tile_n=None, force_pallas=False):
    """FocalLoss.forward.  Tiny-C heads (C < 16) use the XLA path unless force_pallas=True."""
    _, c = logits.shape
    if c < 16 and not force_pallas:
        # With e.g. C=4 only 4 of 128 lanes of every vreg / DMA row are useful in the Pallas
        # layout; let XLA fuse it instead.
        return _focal_loss_xla(logits, targets, gamma, alpha)
    return _focal_loss_pallas(logits, targets, gamma, alpha, tile_n=tile_n)


if __name__ == "__main__":
    key = jax.random.PRNGKey(0)
    k1, k2, k3, k4 = jax.random.split(key, 4)

    # Small classifier-head shapes consistent with the module: (N, C) logits, (N,) targets.
    batch, num_classes = 8, 4
    logits = jax.random.normal(k1, (batch, num_classes), dtype=jnp.float32)
    targets = jax.random.randint(k2, (batch,), 0, num_classes, dtype=jnp.int32)

    # Force the Pallas path at the tiny-C demo shape (FocalLoss(gamma=2, alpha=1)).
    loss = focal_loss(logits, targets, gamma=2.0, alpha=1.0, force_pallas=True)
    jax.block_until_ready(loss)
    ref = _focal_loss_xla(logits, targets, 2.0, 1.0)
    assert jnp.allclose(loss, ref, rtol=1e-5, atol=1e-6), (loss, ref)

    # Larger-C, multi-tile, ragged-last-tile path; bf16 logits on the HBM wire, auto tile.
    n2, c2 = 1000, 256
    logits2 = jax.random.normal(k3, (n2, c2), dtype=jnp.float32).astype(jnp.bfloat16)
    targets2 = jax.random.randint(k4, (n2,), 0, c2, dtype=jnp.int32)
    loss2 = focal_loss(logits2, targets2, gamma=2.0, alpha=1.0)   # C>=16 -> Pallas kernel
    jax.block_until_ready(loss2)
    ref2 = _focal_loss_xla(logits2, targets2, 2.0, 1.0)
    assert jnp.allclose(loss2, ref2, rtol=1e-4, atol=1e-5), (loss2, ref2)

    print("KERNEL_OK")
</pallas_src>

<mosaic_0001>
module attributes {stable_mosaic.version = 11 : i64} {
  func.func @_focal_loss_kernel(%arg0: i32, %arg1: memref<8x4xf32, #tpu.memory_space<vmem>>, %arg2: memref<8x1xi32, #tpu.memory_space<vmem>>, %arg3: memref<1x1x128xf32, #tpu.memory_space<vmem>>) attributes {dimension_semantics = [#tpu.dimension_semantics<parallel>], iteration_bounds = array<i64: 1>, scalar_prefetch = 0 : i64, scratch_operands = 0 : i64, tpu.core_type = #tpu.core_type<tc>, window_params = [{transform_indices = @transform_0, window_bounds = array<i64: 8, 4>}, {transform_indices = @transform_1, window_bounds = array<i64: 8, 1>}, {transform_indices = @transform_2, window_bounds = array<i64: 1, 1, 128>}]} {
    %c0 = arith.constant 0 : index
    %c0_0 = arith.constant 0 : index
    %0 = vector.load %arg1[%c0, %c0_0] : memref<8x4xf32, #tpu.memory_space<vmem>>, vector<8x4xf32>
    %c0_1 = arith.constant 0 : index
    %c0_2 = arith.constant 0 : index
    %1 = vector.load %arg2[%c0_1, %c0_2] : memref<8x1xi32, #tpu.memory_space<vmem>>, vector<8x1xi32>
    %2 = tpu.iota {dimensions = array<i32: 0>} : vector<8x1xi32>
    %c8_i32 = arith.constant 8 : i32
    %3 = arith.muli %arg0, %c8_i32 : i32
    %4 = vector.broadcast %3 : i32 to vector<8x1xi32>
    %5 = arith.addi %4, %2 : vector<8x1xi32>
    %c8_i32_3 = arith.constant 8 : i32
    %6 = vector.broadcast %c8_i32_3 : i32 to vector<8x1xi32>
    %7 = arith.cmpi slt, %5, %6 : vector<8x1xi32>
    %8 = tpu.iota {dimensions = array<i32: 1>} : vector<8x4xi32>
    %9 = vector.broadcast %1 : vector<8x1xi32> to vector<8x4xi32>
    %10 = arith.cmpi eq, %8, %9 : vector<8x4xi32>
    %cst = arith.constant 0.000000e+00 : f32
    %11 = vector.broadcast %cst : f32 to vector<8x4xf32>
    %12 = arith.select %10, %0, %11 : vector<8x4xi1>, vector<8x4xf32>
    %cst_4 = arith.constant dense<0.000000e+00> : vector<8xf32>
    %13 = vector.multi_reduction <add>, %12, %cst_4 [1] : vector<8x4xf32> to vector<8xf32>
    %14 = vector.shape_cast %13 : vector<8xf32> to vector<8x1xf32>
    %cst_5 = arith.constant dense<0xFF800000> : vector<8xf32>
    %15 = vector.multi_reduction <maximumf>, %0, %cst_5 [1] : vector<8x4xf32> to vector<8xf32>
    %16 = vector.shape_cast %15 : vector<8xf32> to vector<8x1xf32>
    %17 = vector.broadcast %16 : vector<8x1xf32> to vector<8x4xf32>
    %18 = arith.subf %0, %17 : vector<8x4xf32>
    %19 = math.exp %18 : vector<8x4xf32>
    %cst_6 = arith.constant dense<0.000000e+00> : vector<8xf32>
    %20 = vector.multi_reduction <add>, %19, %cst_6 [1] : vector<8x4xf32> to vector<8xf32>
    %21 = vector.shape_cast %20 : vector<8xf32> to vector<8x1xf32>
    %22 = math.log %21 : vector<8x1xf32>
    %23 = arith.addf %16, %22 : vector<8x1xf32>
    %24 = arith.subf %23, %14 : vector<8x1xf32>
    %cst_7 = arith.constant 0.000000e+00 : f32
    %25 = vector.broadcast %cst_7 : f32 to vector<8x1xf32>
    %26 = arith.maximumf %24, %25 : vector<8x1xf32>
    %cst_8 = arith.constant 0.000000e+00 : f32
    %27 = vector.broadcast %cst_8 : f32 to vector<8x1xf32>
    %28 = arith.subf %27, %26 : vector<8x1xf32>
    %29 = math.exp %28 : vector<8x1xf32>
    %cst_9 = arith.constant 1.000000e+00 : f32
    %30 = vector.broadcast %cst_9 : f32 to vector<8x1xf32>
    %31 = arith.subf %30, %29 : vector<8x1xf32>
    %cst_10 = arith.constant 0.000000e+00 : f32
    %32 = vector.broadcast %cst_10 : f32 to vector<8x1xf32>
    %33 = arith.maximumf %31, %32 : vector<8x1xf32>
    %34 = arith.mulf %33, %33 : vector<8x1xf32>
    %cst_11 = arith.constant 1.000000e+00 : f32
    %35 = vector.broadcast %cst_11 : f32 to vector<8x1xf32>
    %36 = arith.mulf %35, %34 : vector<8x1xf32>
    %37 = arith.mulf %36, %26 : vector<8x1xf32>
    %cst_12 = arith.constant 0.000000e+00 : f32
    %38 = vector.broadcast %cst_12 : f32 to vector<8x1xf32>
    %39 = arith.select %7, %37, %38 : vector<8x1xi1>, vector<8x1xf32>
    %40 = vector.shape_cast %39 : vector<8x1xf32> to vector<1x8x1xf32>
    %cst_13 = arith.constant dense<0.000000e+00> : vector<1xf32>
    %41 = vector.multi_reduction <add>, %40, %cst_13 [1, 2] : vector<1x8x1xf32> to vector<1xf32>
    %42 = vector.shape_cast %41 : vector<1xf32> to vector<1x1x1xf32>
    %43 = vector.extract %42[0, 0, 0] : f32 from vector<1x1x1xf32>
    %44 = tpu.iota {dimensions = array<i32: 2>} : vector<1x1x128xi32>
    %c0_i32 = arith.constant 0 : i32
    %45 = vector.broadcast %c0_i32 : i32 to vector<1x1x128xi32>
    %46 = arith.cmpi eq, %44, %45 : vector<1x1x128xi32>
    %cst_14 = arith.constant 0.000000e+00 : f32
    %47 = vector.broadcast %43 : f32 to vector<1x1x128xf32>
    %48 = vector.broadcast %cst_14 : f32 to vector<1x1x128xf32>
    %49 = arith.select %46, %47, %48 : vector<1x1x128xi1>, vector<1x1x128xf32>
    %c0_15 = arith.constant 0 : index
    %c0_16 = arith.constant 0 : index
    %c0_17 = arith.constant 0 : index
    %50 = vector.load %arg3[%c0_15, %c0_16, %c0_17] : memref<1x1x128xf32, #tpu.memory_space<vmem>>, vector<1x1x128xf32>
    tpu.vector_store %arg3[%c0_15, %c0_16, %c0_17], %49 {strides = array<i32>} : memref<1x1x128xf32, #tpu.memory_space<vmem>>, vector<1x1x128xf32>,
    return
  }
  func.func @transform_0(%arg0: i32) -> (i32, i32) {
    %c0_i32 = arith.constant 0 : i32
    %c0_i32_0 = arith.constant 0 : i32
    return %arg0, %c0_i32 : i32, i32
  }
  func.func @transform_1(%arg0: i32) -> (i32, i32) {
    %c0_i32 = arith.constant 0 : i32
    %c0_i32_0 = arith.constant 0 : i32
    return %arg0, %c0_i32 : i32, i32
  }
  func.func @transform_2(%arg0: i32) -> (i32, i32, i32) {
    %c0_i32 = arith.constant 0 : i32
    %c0_i32_0 = arith.constant 0 : i32
    %c0_i32_1 = arith.constant 0 : i32
    return %arg0, %c0_i32, %c0_i32_0 : i32, i32, i32
  }
}

</mosaic_0001>

<bundles_post_ra>
// kernel: tpu_custom_call.1
= control target key start
LH: loop header
LB: loop body
LE: loop exit
PB: predicated region body
PF: predicated region fallthrough
CT: control target
= control target key end

     0   :  { %vm27_vm0 = vcmask 31744   ;;  %s150_s0 = inlined_call_operand.vmem [shape: f32[8,4], index: 0, kind: input, shape index: {}]   ;;  %s151_s1 = inlined_call_operand.vmem [shape: s32[8,1], index: 1, kind: input, shape index: {}]   ;;  %s152_s2 = inlined_call_operand.hbm [shape: f32[1,1,128], index: 2, kind: output, shape index: {}]  }
   0x1   :  { %v12_v0 = vld [vmem:[%s150_s0] sm:$0xff] }
   0x2   :  { %7 = vsyncpa [#allocation3], 0  ;;  %v31_v1 = vsel %vm27_vm0, %v12_v0, -inf  ;;  %v121_v2 = vmov 0   ;;  %v13_v3 = vld [vmem:[%s151_s1] sm:$0xff]  ;;  %v20_v9 = vlaneseq  ;;  %vm53_vm2 = vcmask 7168  }
   0x3   :  { %88 = vset.pattern.permute.xlu0 %v121_v2  ;;  %s122_s0 = smov [#allocation2]   ;;  %s75_s15 = sshll.u32 %s152_s2, 4  ;;  %s76_s15 = int_to_ptr.hbm [resolvable:$true] %s75_s15 }
   0x4   :  { %32 = vmax.xlane.f32.xlu0 %v31_v1  ;;  %v21_v10 = vand.u32 127, %v20_v9  ;;  %s73_s1 = sshll.u32 %s122_s0, 4  ;;  %s74_s1 = int_to_ptr.vmem [resolvable:$true] %s73_s1 }
   0x6   :  { %vm64_vm3 = vcmp.eq.s32.totalorder %v21_v10, 0 }
  0x18   :  { %23 = vperm.xlu0 %88, %v13_v3  }
  0x77   :  { %v33_v4 = vpop.xlane.xlu0 %32 }
  0x78   :  { %v34_v5 = vsub.f32 %v12_v0, %v33_v4 }
  0x7a   :  { %v35_v6 = vmul.f32 1.442695, %v34_v5 }
  0x7c   :  { %89 = vpow2.f32 %v35_v6 }
  0x82   :  { %v90_v7 = vpop.eup %89 }
  0x83   :  { %v37_v8 = vsel %vm27_vm0, %v90_v7, 0.0 }
  0x84   :  { %38 = vadd.xlane.f32.xlu1 %v37_v8 }
  0x8a   :  { %v24_v11 = vpop.permute.xlu0 %23 }
  0x8b   :  { %vm25_vm1 = vcmp.eq.s32.totalorder %v21_v10, %v24_v11 }
  0x8c   :  { %v26_v12 = vsel %vm25_vm1, %v12_v0, 0.0 }
  0x8d   :  { %v28_v13 = vsel %vm27_vm0, %v26_v12, 0.0 }
  0x8e   :  { %29 = vadd.xlane.f32.xlu1 %v28_v13 }
  0xf7   :  { %v39_v14 = vpop.xlane.xlu1 %38 }
  0xf8   :  { %91 = vlog2.f32 %v39_v14 }
  0xfe   :  { %v92_v15 = vpop.eup %91 }
  0xff   :  { %v41_v16 = vmul.f32 0.6931472, %v92_v15 }
 0x101   :  { %v42_v17 = vadd.f32 %v41_v16, %v33_v4  ;;  %v30_v18 = vpop.xlane.xlu1 %29 }
 0x103   :  { %v43_v19 = vsub.f32 %v42_v17, %v30_v18 }
 0x105   :  { %v44_v20 = vmax.f32 %v43_v19, 0.0 }
 0x107   :  { %v45_v21 = vsub.f32 0.0, %v44_v20 }
 0x109   :  { %v46_v22 = vmul.f32 1.442695, %v45_v21 }
 0x10b   :  { %93 = vpow2.f32 %v46_v22 }
 0x111   :  { %v94_v23 = vpop.eup %93 }
 0x112   :  { %v48_v24 = vsub.f32 1.0, %v94_v23 }
 0x114   :  { %v49_v25 = vmax.f32 %v48_v24, 0.0 }
 0x116   :  { %v50_v26 = vmul.f32 %v49_v25, %v49_v25 }
 0x118   :  { %v51_v27 = vmul.f32 %v50_v26, %v44_v20 }
 0x11a   :  { %v54_v28 = vsel %vm53_vm2, %v51_v27, 0.0 }
 0x11b   :  { %55 = vadd.xlane.f32.xlu2 %v54_v28 }
 0x18e   :  { %v56_v29 = vpop.xlane.xlu2 %55 }
 0x18f   :  { %v57_v30 = vrot.slane %v56_v29, 4 }
 0x191   :  { %v58_v31 = vadd.f32 %v57_v30, %v56_v29 }
 0x193   :  { %v59_v32 = vrot.slane %v58_v31, 2 }
 0x195   :  { %v60_v33 = vadd.f32 %v59_v32, %v58_v31 }
 0x197   :  { %v61_v34 = vrot.slane %v60_v33, 1 }
 0x199   :  { %v62_v35 = vadd.f32 %v61_v34, %v60_v33 }
 0x19b   :  { %84 = vpush %v62_v35 }
 0x1cc   :  { %s85_s16 = spop %84 }
 0x1cd   :  { %v65_v36 = vstv %s85_s16 }
 0x1ce   :  { %v66_v37 = vsel %vm64_vm3, %v65_v36, 0.0 }
 0x1cf   :  { %67 = vst [vmem:[#allocation2] sm:$0x1] %v66_v37 }
 0x1d0   :  { %78 = dma.vmem_to_hbm [thread:$0]  %s74_s1, 16, %s76_s15, [#allocation3]  }
 0x1d1   :  { %119 = dma.done.wait [#allocation3], 16  }
 0x1d2   :  { %120 = vsyncadd [#allocation3], 4294967280 }
 0x1d3   :  { %83 = vsyncpa [#allocation3], 1 }

</bundles_post_ra>
